<compile_context>
chip_gen: v5e
topology: v5e:2x2
jax: 0.10.0
libtpu: 0.0.40
codegen_flags: <defaults>
</compile_context>

<pallas_src>
import math
from functools import partial

import jax
import jax.numpy as jnp
from jax.experimental import pallas as pl
from jax.experimental.pallas import tpu as pltpu


def _conv_bn_relu_kernel(x_ref, w_ref, bias_ref, o_ref):
    # x_ref:    (C_in, T_HW)    pixels of one image, lane axis = spatial
    # w_ref:    (T_CO, C_in)    conv-weight tile with BN scale pre-folded
    # bias_ref: (T_CO, 1)       folded conv-bias + BN shift
    # o_ref:    (T_CO, T_HW)    lane-dense output tile
    y = jnp.dot(w_ref[...], x_ref[...], preferred_element_type=jnp.float32)
    y = y + bias_ref[...]
    o_ref[...] = jnp.maximum(y, 0.0).astype(o_ref.dtype)


def _vmem_capacity_bytes():
    """Physical VMEM of the attached TPU; conservative fallback if unknown."""
    try:
        cap = int(getattr(pltpu.get_tpu_info(), "vmem_capacity_bytes", 0))
        if cap > 0:
            return cap
    except Exception:
        pass
    return 64 << 20  # assume the smallest (v7x-sized) VMEM


def _round_up(v, m):
    return -(-v // m) * m


def _plan_tiles(hw, c_in, c_out, x_bytes, out_bytes, w_bytes):
    """Pick (t_hw, t_co, vmem_limit_bytes).

    * t_hw: lane-dense spatial tile (multiple of 128, or the full H*W extent)
      sized so each streamed x / out block reaches a per-block byte target
      (~2 MiB on v5e/v6e, ~4 MiB on v7x) while the full double-buffered
      footprint (x + out + folded weight + bias) stays inside a
      generation-dependent VMEM budget.
    * t_co: C_out tile.  Full C_out for small channel counts; 256/128 for
      C_out >= 512 so weight/output blocks stay small and roughly MXU-shaped.
    * vmem_limit_bytes: explicit scoped-VMEM request = footprint + headroom.
    """
    vmem_phys = _vmem_capacity_bytes()
    if vmem_phys <= (80 << 20):            # v7x-class: 64 MiB VMEM, ~3.2 TB/s HBM
        budget, target = 44 << 20, 4 << 20
    else:                                  # v5e / v6e: 128 MiB physical VMEM
        budget, target = 64 << 20, 2 << 20

    # C_out tiling for big channel counts.
    if c_out >= 512:
        if c_out % 256 == 0:
            t_co = 256
        elif c_out % 128 == 0:
            t_co = 128                     # also the better match for v5e's 128-wide MXU
        else:
            t_co = 256                     # ragged last C_out block (masked on store)
    else:
        t_co = c_out

    pad8 = lambda v: _round_up(v, 8)       # sublane padding
    pad128 = lambda v: _round_up(v, 128)   # lane padding

    # Fixed VMEM: double-buffered folded-weight + bias blocks (padded layout).
    fixed = 2 * (pad8(t_co) * pad128(c_in) * w_bytes + pad8(t_co) * 128 * 4)

    # Streaming VMEM per output column: double-buffered x + out blocks.
    per_col = 2 * (pad8(c_in) * x_bytes + pad8(t_co) * out_bytes)

    # Largest column count the budget allows (multiple of 128).
    max_cols = max(128, ((budget - fixed) // per_col) // 128 * 128)

    # Columns needed for each streamed block to hit the byte target.
    need = max(-(-target // (pad8(c_in) * x_bytes)),
               -(-target // (pad8(t_co) * out_bytes)))
    desired = max(128, pad128(need))

    if hw <= 2 * desired and fixed + hw * per_col <= budget:
        t_hw = hw                          # whole image (full spatial extent) per block
    else:
        t_hw = min(max_cols, desired, pad128(hw))
        # Prefer a tile that divides HW evenly (avoids a ragged last block).
        for cand in range(t_hw, max(127, t_hw // 2 - 1), -128):
            if hw % cand == 0:
                t_hw = cand
                break

    footprint = fixed + per_col * t_hw
    vmem_limit = int(min(vmem_phys - (8 << 20),
                         max(16 << 20, footprint + (12 << 20))))
    return t_hw, t_co, vmem_limit


@partial(jax.jit, static_argnames=("eps", "out_dtype"))
def conv1x1_forward(x_nchw, conv_w, conv_b, bn_gamma, bn_beta, bn_mean, bn_var,
                    eps=1e-5, out_dtype=None):
    """Conv2d(1x1, stride=1, pad=0) -> BatchNorm2d (eval) -> ReLU, NCHW layout."""
    N, C_in, H, W = x_nchw.shape
    C_out = conv_w.shape[0]
    HW = H * W
    out_dtype = x_nchw.dtype if out_dtype is None else jnp.dtype(out_dtype)

    # NCHW -> (N, C_in, H*W): contiguous reshape, no data movement.
    x = x_nchw.reshape(N, C_in, HW)

    # Fold eval-mode BN into the conv weight / bias:
    #   bn(conv(x)) = (w * scale) @ x + ((b_conv - mean) * scale + beta)
    scale = bn_gamma / jnp.sqrt(bn_var + eps)                       # (C_out,)
    w_folded = (conv_w.reshape(C_out, C_in) * scale[:, None]).astype(x.dtype)
    bias = ((conv_b - bn_mean) * scale + bn_beta).reshape(C_out, 1)
    bias = bias.astype(jnp.float32)

    t_hw, t_co, vmem_limit = _plan_tiles(
        HW, C_in, C_out,
        x.dtype.itemsize, jnp.dtype(out_dtype).itemsize, w_folded.dtype.itemsize)

    # Big axis (HW tiles) first so v7x's 2 TensorCores shard it even at N=1.
    grid = (pl.cdiv(HW, t_hw), pl.cdiv(C_out, t_co), N)

    out = pl.pallas_call(
        _conv_bn_relu_kernel,
        out_shape=jax.ShapeDtypeStruct((N, C_out, HW), out_dtype),
        grid_spec=pltpu.PrefetchScalarGridSpec(
            num_scalar_prefetch=0,
            grid=grid,
            in_specs=[
                # One image's (C_in, t_hw) pixel slab; lane axis = spatial.
                pl.BlockSpec((None, C_in, t_hw), lambda j, c, n: (n, 0, j)),
                # Folded weight tile: index depends only on c, so Pallas
                # re-fetches it only when the C_out tile changes.
                pl.BlockSpec((t_co, C_in), lambda j, c, n: (c, 0)),
                # Folded bias tile.
                pl.BlockSpec((t_co, 1), lambda j, c, n: (c, 0)),
            ],
            out_specs=pl.BlockSpec((None, t_co, t_hw), lambda j, c, n: (n, c, j)),
        ),
        compiler_params=pltpu.CompilerParams(
            # All grid axes are independent (no cross-step accumulation).
            dimension_semantics=("parallel", "parallel", "parallel"),
            vmem_limit_bytes=vmem_limit),
    )(x, w_folded, bias)

    # (N, C_out, H*W) -> NCHW: contiguous reshape, no data movement.
    return out.reshape(N, C_out, H, W)


def init_params(key, in_ch, out_ch):
    """Deterministic init mirroring PyTorch defaults for Conv2d/BatchNorm2d."""
    k_w, k_b = jax.random.split(key)
    fan_in = in_ch * 1 * 1
    bound = 1.0 / math.sqrt(fan_in)
    conv_w = jax.random.uniform(k_w, (out_ch, in_ch, 1, 1), jnp.float32,
                                minval=-bound, maxval=bound)
    conv_b = jax.random.uniform(k_b, (out_ch,), jnp.float32,
                                minval=-bound, maxval=bound)
    bn_gamma = jnp.ones((out_ch,), jnp.float32)
    bn_beta = jnp.zeros((out_ch,), jnp.float32)
    bn_mean = jnp.zeros((out_ch,), jnp.float32)
    bn_var = jnp.ones((out_ch,), jnp.float32)
    return conv_w, conv_b, bn_gamma, bn_beta, bn_mean, bn_var


if __name__ == "__main__":
    key = jax.random.PRNGKey(0)
    k_x, k_p = jax.random.split(key)

    N, C_in, H, W = 2, 4, 16, 16
    C_out = 8

    x = jax.random.normal(k_x, (N, C_in, H, W), jnp.float32)
    params = init_params(k_p, C_in, C_out)

    out = conv1x1_forward(x, *params)
    out = jax.block_until_ready(out)

    # Reference in plain JAX (eval-mode BN), same semantics as the PyTorch module.
    conv_w, conv_b, g, b, m, v = params
    ref = jnp.einsum("nchw,oc->nohw", x, conv_w.reshape(C_out, C_in)) \
        + conv_b.reshape(1, C_out, 1, 1)
    ref = (ref - m.reshape(1, C_out, 1, 1)) / jnp.sqrt(v.reshape(1, C_out, 1, 1) + 1e-5)
    ref = ref * g.reshape(1, C_out, 1, 1) + b.reshape(1, C_out, 1, 1)
    ref = jnp.maximum(ref, 0.0)
    assert out.shape == (N, C_out, H, W)
    assert jnp.allclose(out, ref, atol=2e-5, rtol=2e-5)

    print("KERNEL_OK")
</pallas_src>

<mosaic_0001>
module attributes {stable_mosaic.version = 11 : i64} {
  func.func @_conv_bn_relu_kernel(%arg0: i32, %arg1: i32, %arg2: i32, %arg3: memref<1x4x256xf32, #tpu.memory_space<vmem>>, %arg4: memref<8x4xf32, #tpu.memory_space<vmem>>, %arg5: memref<8x1xf32, #tpu.memory_space<vmem>>, %arg6: memref<1x8x256xf32, #tpu.memory_space<vmem>>) attributes {dimension_semantics = [#tpu.dimension_semantics<parallel>, #tpu.dimension_semantics<parallel>, #tpu.dimension_semantics<parallel>], iteration_bounds = array<i64: 1, 1, 2>, scalar_prefetch = 0 : i64, scratch_operands = 0 : i64, tpu.core_type = #tpu.core_type<tc>, window_params = [{transform_indices = @transform_0, window_bounds = array<i64: 1, 4, 256>}, {transform_indices = @transform_1, window_bounds = array<i64: 8, 4>}, {transform_indices = @transform_2, window_bounds = array<i64: 8, 1>}, {transform_indices = @transform_3, window_bounds = array<i64: 1, 8, 256>}]} {
    %c0 = arith.constant 0 : index
    %c0_0 = arith.constant 0 : index
    %0 = vector.load %arg4[%c0, %c0_0] : memref<8x4xf32, #tpu.memory_space<vmem>>, vector<8x4xf32>
    %c0_1 = arith.constant 0 : index
    %c0_2 = arith.constant 0 : index
    %c0_3 = arith.constant 0 : index
    %1 = vector.load %arg3[%c0_1, %c0_2, %c0_3] : memref<1x4x256xf32, #tpu.memory_space<vmem>>, vector<1x4x256xf32>
    %2 = vector.shape_cast %1 : vector<1x4x256xf32> to vector<4x256xf32>
    %cst = arith.constant dense<0.000000e+00> : vector<8x256xf32>
    %3 = tpu.matmul %0, %2, %cst {dimension_numbers = #tpu.dot_dimension_numbers<[1], [0], [0], [1], [0, 0, 1, 1], [], []>} : vector<8x4xf32>, vector<4x256xf32>, vector<8x256xf32> -> vector<8x256xf32>
    %c0_4 = arith.constant 0 : index
    %c0_5 = arith.constant 0 : index
    %4 = vector.load %arg5[%c0_4, %c0_5] : memref<8x1xf32, #tpu.memory_space<vmem>>, vector<8x1xf32>
    %5 = vector.broadcast %4 : vector<8x1xf32> to vector<8x256xf32>
    %6 = arith.addf %3, %5 : vector<8x256xf32>
    %cst_6 = arith.constant 0.000000e+00 : f32
    %7 = vector.broadcast %cst_6 : f32 to vector<8x256xf32>
    %8 = arith.maximumf %6, %7 : vector<8x256xf32>
    %c0_7 = arith.constant 0 : index
    %c0_8 = arith.constant 0 : index
    %c0_9 = arith.constant 0 : index
    %9 = vector.load %arg6[%c0_7, %c0_8, %c0_9] : memref<1x8x256xf32, #tpu.memory_space<vmem>>, vector<1x8x256xf32>
    %10 = vector.shape_cast %9 : vector<1x8x256xf32> to vector<8x256xf32>
    %11 = vector.shape_cast %8 : vector<8x256xf32> to vector<1x8x256xf32>
    tpu.vector_store %arg6[%c0_7, %c0_8, %c0_9], %11 {strides = array<i32>} : memref<1x8x256xf32, #tpu.memory_space<vmem>>, vector<1x8x256xf32>,
    return
  }
  func.func @transform_0(%arg0: i32, %arg1: i32, %arg2: i32) -> (i32, i32, i32) {
    %c0_i32 = arith.constant 0 : i32
    %c0_i32_0 = arith.constant 0 : i32
    return %arg2, %c0_i32, %arg0 : i32, i32, i32
  }
  func.func @transform_1(%arg0: i32, %arg1: i32, %arg2: i32) -> (i32, i32) {
    %c0_i32 = arith.constant 0 : i32
    %c0_i32_0 = arith.constant 0 : i32
    return %arg1, %c0_i32 : i32, i32
  }
  func.func @transform_2(%arg0: i32, %arg1: i32, %arg2: i32) -> (i32, i32) {
    %c0_i32 = arith.constant 0 : i32
    %c0_i32_0 = arith.constant 0 : i32
    return %arg1, %c0_i32 : i32, i32
  }
  func.func @transform_3(%arg0: i32, %arg1: i32, %arg2: i32) -> (i32, i32, i32) {
    %c0_i32 = arith.constant 0 : i32
    return %arg2, %arg1, %arg0 : i32, i32, i32
  }
}

</mosaic_0001>

<bundles_post_ra>
// kernel: conv1x1_forward.1
= control target key start
LH: loop header
LB: loop body
LE: loop exit
PB: predicated region body
PF: predicated region fallthrough
CT: control target
= control target key end

     0   :  { %s552_s12 = smov 0   ;;  %s554_s13 = smov 0   ;;  %s591_s0 = inlined_call_operand.vmem [shape: f32[2,4,256], index: 0, kind: input, shape index: {}]   ;;  %s592_s1 = inlined_call_operand.vmem [shape: f32[8,4], index: 1, kind: input, shape index: {}]   ;;  %s593_s2 = inlined_call_operand.vmem [shape: f32[8,1], index: 2, kind: input, shape index: {}]   ;;  %s594_s3 = inlined_call_operand.vmem [shape: f32[2,8,256], index: 3, kind: output, shape index: {}]  }
   0x1   :  { %s556_s14 = smov 0  }
   0x2 LB: > { %s25_s15 = sadd.s32 1, %s525_s13  ;;  %p468_p0 = scmp.ge.s32.totalorder %s529_s14, 1  ;;  %s529_s14 = sphi %s556_s14, %s13_s14   ;;  %s525_s13 = sphi %s554_s13, %s596_s13   ;;  %s521_s12 = sphi %s552_s12, %s595_s12  }
   0x3   : > { %p26_p1 = scmp.ge.s32.totalorder %s25_s15, 2  ;;  %p185_p2 = scmp.lt.s32.totalorder %s529_s14, 3 }
   0x5   : > { %s598_s15 = smov (%p26_p1, %s25_s15), 0  ;;  %p186_p3 = pnand %p468_p0, %p185_p2 }
   0x6   : > { %p230_p4 = scmp.lt.s32.totalorder (!%p186_p3), %s521_s12, 1 }
   0x7   : > { %189 = sbr.rel (%p186_p3) target bundleno = 157 (0x9d), region = 32 }
   0xc   : > { %v263_v0 = vld [vmem:[%s593_s2] sm:$0xff]  ;;  %v531_v1 = vmov 0   ;;  %s600_s12 = smov (!%p230_p4, %s521_s12), 1  ;;  %vm277_vm0 = vcmask 1043456   ;;  %vm273_vm1 = vcmask 31744  }
   0xd   : > { %506 = vset.pattern.permute.xlu0 %v531_v1  ;;  %s479_s18 = sshll.u32 %s600_s12, 3  ;;  %v261_v3 = vld [vmem:[%s592_s1] sm:$0xff]  ;;  %s480_s24 = sshll.u32 %s600_s12, 4 }
   0xe   : > { %266 = vperm.xlu0 %506, %v263_v0   ;;  %s237_s21 = scalar_lea.vmem %s591_s0, %s479_s18  ;;  %s259_s27 = scalar_lea.vmem %s594_s3, %s480_s24 }
   0xf   : > { %v262_v2 = vld [vmem:[%s237_s21] sm:$0xff] }
  0x10   : > { %270 = vst [vmem:[#allocation1] ss:$2 sm:$0xff] %v262_v2 }
  0x17   : > { %v271_v4 = vld.sshfl [vmem:[#allocation1] sm:$0xff pattern:$0x75316420]  ;;  %v272_v5 = vld.sshfl [vmem:[#allocation1 + $0x8] sm:$0xff pattern:$0x75316420] }
  0x18   : > { %473 = vmatpush.msk.msra.mxu0 %vm277_vm0, %v271_v4  ;;  %475 = vmatpush.msk.msra.mxu1 %vm277_vm0, %v272_v5 }
  0x19   : > { %474 = vmatmul.msk.f32.vlgmr.msra.gmra.mxu0 %vm273_vm1, %v261_v3  ;;  %476 = vmatmul.msk.f32.vlgmr.msra.gmra.mxu1 %vm273_vm1, %v261_v3 }
  0x80   : > { %v267_v6 = vpop.permute.xlu0 %266 }
  0x96   : > { %v299_v7 = vpop.f32.mrf.mxu0  ;;  %v319_v8 = vpop.f32.mrf.mxu1 }
  0x97   : > { %v300_v9 = vadd.f32 %v299_v7, %v267_v6  ;;  %v320_v10 = vadd.f32 %v319_v8, %v267_v6 }
  0x99   : > { %v322_v11 = vmax.f32 %v300_v9, 0.0  ;;  %v323_v12 = vmax.f32 %v320_v10, 0.0 }
  0x9b   : > { %324 = vst [vmem:[%s259_s27] sm:$0xff] %v322_v11 }
  0x9c   : > { %325 = vst [vmem:[%s259_s27 + $0x8] sm:$0xff] %v323_v12 }
  0x9d PF: > { %s13_s14 = sadd.s32 1, %s529_s14   ;;  %s595_s12 = smov %s525_s13 }
  0x9e   : > { %p10_p5 = scmp.ge.s32.totalorder %s13_s14, 4   ;;  %s596_s13 = smov %s598_s15 }
  0xa0   :  { %12 = sbr.rel (!%p10_p5) target bundleno = 2 (0x2), region = 68 }

</bundles_post_ra>
